<compile_context>
chip_gen: v5e
topology: v5e:2x2
jax: 0.10.0
libtpu: 0.0.40
codegen_flags: <defaults>
</compile_context>

<pallas_src>
import functools

import jax
import jax.numpy as jnp
from jax.experimental import pallas as pl
from jax.experimental.pallas import tpu as pltpu


# ------------------------------- fused kernel ------------------------------- #

def _fused_tcn_kernel(*refs, k, dilations, out_dim, out_lanes):
    """All TemporalBlocks + mean + Linear + sigmoid for one batch tile.

    refs layout:
      refs[0]                      : x tile, (BT, L, C_in)   channels-last
      refs[1 + 2*i]                : block-i weight, (k*C_in_i, C_out_i)  (im2col layout)
      refs[2 + 2*i]                : block-i bias,   (1, C_out_i)
      refs[1 + 2*n]                : fc weight, (C_last, out_dim)
      refs[2 + 2*n]                : fc bias,   (1, out_dim)
      refs[3 + 2*n]                : output tile, (1, BT, out_lanes)
    """
    nblocks = len(dilations)
    x_ref = refs[0]
    conv_refs = refs[1:1 + 2 * nblocks]
    fcw_ref = refs[1 + 2 * nblocks]
    fcb_ref = refs[2 + 2 * nblocks]
    o_ref = refs[3 + 2 * nblocks]

    bt = x_ref.shape[0]
    feats = []
    for b in range(bt):                              # static unroll over the batch tile
        h = x_ref[b].astype(jnp.float32)             # (L, C_in)
        for i, d in enumerate(dilations):
            w = conv_refs[2 * i][...]                # (k*C_in, C_out)
            bias = conv_refs[2 * i + 1][...]         # (1, C_out)
            l_in, c_in = h.shape
            pad = (k - 1) * d
            l_out = l_in + pad                       # = L + 2*pad - d*(k-1), no chomp
            if pad > 0:                              # in-kernel zero padding (both sides)
                z = jnp.zeros((pad, c_in), jnp.float32)
                hp = jnp.concatenate([z, h, z], axis=0)
            else:
                hp = h
            # im2col: cols[t, j*C_in + ci] = x_pad[t + j*d, ci]
            cols = jnp.concatenate(
                [hp[j * d: j * d + l_out, :] for j in range(k)], axis=1)
            y = jnp.dot(cols.astype(w.dtype), w,
                        preferred_element_type=jnp.float32) + bias
            h = jnp.maximum(y, 0.0)                  # ReLU; Dropout = identity (eval)
        feats.append(jnp.mean(h, axis=0, keepdims=True))        # (1, C_last)

    feat = feats[0] if bt == 1 else jnp.concatenate(feats, axis=0)   # (BT, C_last)
    fcw = fcw_ref[...]
    logits = jnp.dot(feat.astype(fcw.dtype), fcw,
                     preferred_element_type=jnp.float32) + fcb_ref[...]
    probs = jax.nn.sigmoid(logits)                   # (BT, out_dim)
    if out_lanes > out_dim:                          # lane-dense (unmasked) store
        probs = jnp.concatenate(
            [probs, jnp.zeros((bt, out_lanes - out_dim), jnp.float32)], axis=1)
    o_ref[0] = probs


# --------------------------------- wrapper ---------------------------------- #

def tcn_forward(x, block_params, fc_params, *, kernel_size,
                matmul_dtype=jnp.float32):
    """x: (B, L, F) or (B, F); block_params[i] = (W2, bias, dilation);
    fc_params = (fc_w_T (C_last, out_dim), fc_b (1, out_dim)). Returns squeezed probs."""
    if x.ndim == 2:                                  # torch: x.unsqueeze(1) -> length 1
        x = x[:, None, :]
    x = x.astype(jnp.float32)                        # channels-last: (B, L, C); no permute
    B, L, F = x.shape

    nbt = 2 if (B >= 2 and B % 2 == 0) else 1        # parallel grid axis (v7x: 2 TCs)
    bt = B // nbt
    dilations = tuple(int(d) for (_, _, d) in block_params)
    fcw, fcb = fc_params
    out_dim = fcw.shape[1]
    out_lanes = ((out_dim + 127) // 128) * 128       # lane-dense output slab

    inputs = [x]
    in_specs = [pl.BlockSpec((bt, L, F), lambda bi: (bi, 0, 0))]
    for (w2, bias, _) in block_params:
        inputs += [w2.astype(matmul_dtype), bias.astype(jnp.float32)]
        in_specs += [pl.BlockSpec(w2.shape, lambda bi: (0, 0)),
                     pl.BlockSpec(bias.shape, lambda bi: (0, 0))]
    inputs += [fcw.astype(matmul_dtype), fcb.astype(jnp.float32)]
    in_specs += [pl.BlockSpec(fcw.shape, lambda bi: (0, 0)),
                 pl.BlockSpec(fcb.shape, lambda bi: (0, 0))]

    kernel = functools.partial(_fused_tcn_kernel, k=kernel_size,
                               dilations=dilations, out_dim=out_dim,
                               out_lanes=out_lanes)
    out = pl.pallas_call(
        kernel,
        out_shape=jax.ShapeDtypeStruct((nbt, bt, out_lanes), jnp.float32),
        grid=(nbt,),
        in_specs=in_specs,
        out_specs=pl.BlockSpec((1, bt, out_lanes), lambda bi: (bi, 0, 0)),
        compiler_params=pltpu.CompilerParams(dimension_semantics=("parallel",)),
    )(*inputs)

    probs = out.reshape(B, out_lanes)[:, :out_dim]
    return jnp.squeeze(probs)                        # torch .squeeze()


# --------------------------- parameter construction ------------------------- #

def init_params(key, input_dim, output_dim, num_channels, kernel_size):
    """Deterministic synthetic params; weight_norm (dim=0) applied to conv weights.

    Conv weights are stored im2col-ready: W2[j*C_in + ci, co] = w[co, ci, j]."""
    block_params = []
    in_ch = input_dim
    for i, out_ch in enumerate(num_channels):
        key, kv, kg, kb = jax.random.split(key, 4)
        v = jax.random.normal(kv, (out_ch, in_ch, kernel_size), jnp.float32) * 0.1
        g = jax.random.uniform(kg, (out_ch, 1, 1), jnp.float32, minval=0.5, maxval=1.5)
        bias = jax.random.normal(kb, (out_ch,), jnp.float32) * 0.1
        norm = jnp.sqrt(jnp.sum(v * v, axis=(1, 2), keepdims=True))
        w = g * v / norm                                         # (C_out, C_in, k)
        w2 = jnp.transpose(w, (2, 1, 0)).reshape(kernel_size * in_ch, out_ch)
        block_params.append((w2, bias.reshape(1, out_ch), 2 ** i))
        in_ch = out_ch
    key, kw, kb = jax.random.split(key, 3)
    fc_w = jax.random.normal(kw, (output_dim, in_ch), jnp.float32) * 0.1
    fc_b = jax.random.normal(kb, (output_dim,), jnp.float32) * 0.1
    return block_params, (fc_w.T, fc_b.reshape(1, output_dim))


# ------------------------------ pure-JAX reference --------------------------- #

def tcn_forward_ref(x, block_params, fc_params, *, kernel_size):
    if x.ndim == 2:
        x = x[:, None, :]
    xc = jnp.transpose(x, (0, 2, 1)).astype(jnp.float32)         # (B, C, L)
    for (w2, bias, d) in block_params:
        c_out = w2.shape[1]
        c_in = w2.shape[0] // kernel_size
        w = jnp.transpose(w2.reshape(kernel_size, c_in, c_out), (2, 1, 0))  # (C_out,C_in,k)
        pad = (kernel_size - 1) * d
        y = jax.lax.conv_general_dilated(
            xc, w, window_strides=(1,), padding=[(pad, pad)],
            rhs_dilation=(d,), dimension_numbers=("NCH", "OIH", "NCH"))
        xc = jnp.maximum(y + bias.reshape(1, c_out, 1), 0.0)
    fcw, fcb = fc_params
    feat = jnp.mean(xc, axis=2)                                  # (B, C_last)
    return jnp.squeeze(jax.nn.sigmoid(feat @ fcw + fcb))


# ----------------------------------- main ------------------------------------ #

if __name__ == "__main__":
    key = jax.random.PRNGKey(0)
    B, L, input_dim = 2, 8, 16
    num_channels = [32, 32]
    output_dim = 1
    kernel_size = 3

    kx, kp = jax.random.split(key)
    x = jax.random.normal(kx, (B, L, input_dim), jnp.float32)
    block_params, fc_params = init_params(kp, input_dim, output_dim,
                                          num_channels, kernel_size)

    y = tcn_forward(x, block_params, fc_params, kernel_size=kernel_size)
    jax.block_until_ready(y)
    assert y.shape == (B,)

    y_ref = tcn_forward_ref(x, block_params, fc_params, kernel_size=kernel_size)
    assert jnp.allclose(y, y_ref, atol=2e-5, rtol=2e-5), (y, y_ref)
    print("KERNEL_OK")
</pallas_src>

<mosaic_0001>
module attributes {stable_mosaic.version = 11 : i64} {
  func.func @_fused_tcn_kernel(%arg0: i32, %arg1: memref<1x8x16xf32, #tpu.memory_space<vmem>>, %arg2: memref<48x32xf32, #tpu.memory_space<vmem>>, %arg3: memref<1x32xf32, #tpu.memory_space<vmem>>, %arg4: memref<96x32xf32, #tpu.memory_space<vmem>>, %arg5: memref<1x32xf32, #tpu.memory_space<vmem>>, %arg6: memref<32x1xf32, #tpu.memory_space<vmem>>, %arg7: memref<1x1xf32, #tpu.memory_space<vmem>>, %arg8: memref<1x1x128xf32, #tpu.memory_space<vmem>>) attributes {dimension_semantics = [#tpu.dimension_semantics<parallel>], iteration_bounds = array<i64: 2>, scalar_prefetch = 0 : i64, scratch_operands = 0 : i64, tpu.core_type = #tpu.core_type<tc>, window_params = [{transform_indices = @transform_0, window_bounds = array<i64: 1, 8, 16>}, {pipeline_mode = #tpu.pipeline_mode<synchronous>, transform_indices = @transform_1, window_bounds = array<i64: 48, 32>}, {pipeline_mode = #tpu.pipeline_mode<synchronous>, transform_indices = @transform_2, window_bounds = array<i64: 1, 32>}, {pipeline_mode = #tpu.pipeline_mode<synchronous>, transform_indices = @transform_3, window_bounds = array<i64: 96, 32>}, {pipeline_mode = #tpu.pipeline_mode<synchronous>, transform_indices = @transform_4, window_bounds = array<i64: 1, 32>}, {pipeline_mode = #tpu.pipeline_mode<synchronous>, transform_indices = @transform_5, window_bounds = array<i64: 32, 1>}, {pipeline_mode = #tpu.pipeline_mode<synchronous>, transform_indices = @transform_6, window_bounds = array<i64: 1, 1>}, {transform_indices = @transform_7, window_bounds = array<i64: 1, 1, 128>}]} {
    %c0 = arith.constant 0 : index
    %c0_0 = arith.constant 0 : index
    %c0_1 = arith.constant 0 : index
    %0 = vector.load %arg1[%c0, %c0_0, %c0_1] : memref<1x8x16xf32, #tpu.memory_space<vmem>>, vector<1x8x16xf32>
    %1 = vector.shape_cast %0 : vector<1x8x16xf32> to vector<8x16xf32>
    %c0_2 = arith.constant 0 : index
    %c0_3 = arith.constant 0 : index
    %2 = vector.load %arg2[%c0_2, %c0_3] : memref<48x32xf32, #tpu.memory_space<vmem>>, vector<48x32xf32>
    %c0_4 = arith.constant 0 : index
    %c0_5 = arith.constant 0 : index
    %3 = vector.load %arg3[%c0_4, %c0_5] : memref<1x32xf32, #tpu.memory_space<vmem>>, vector<1x32xf32>
    %cst = arith.constant 0.000000e+00 : f32
    %4 = vector.broadcast %cst : f32 to vector<2x16xf32>
    %5 = tpu.concatenate %4, %1, %4 in 0 : vector<2x16xf32>, vector<8x16xf32>, vector<2x16xf32> -> vector<12x16xf32>
    %6 = vector.extract_strided_slice %5 {offsets = [0, 0], sizes = [10, 16], strides = [1, 1]} : vector<12x16xf32> to vector<10x16xf32>
    %7 = vector.extract_strided_slice %5 {offsets = [1, 0], sizes = [10, 16], strides = [1, 1]} : vector<12x16xf32> to vector<10x16xf32>
    %8 = vector.extract_strided_slice %5 {offsets = [2, 0], sizes = [10, 16], strides = [1, 1]} : vector<12x16xf32> to vector<10x16xf32>
    %9 = tpu.concatenate %6, %7, %8 in 1 : vector<10x16xf32>, vector<10x16xf32>, vector<10x16xf32> -> vector<10x48xf32>
    %cst_6 = arith.constant dense<0.000000e+00> : vector<10x32xf32>
    %10 = tpu.matmul %9, %2, %cst_6 {dimension_numbers = #tpu.dot_dimension_numbers<[1], [0], [0], [1], [0, 0, 1, 1], [], []>} : vector<10x48xf32>, vector<48x32xf32>, vector<10x32xf32> -> vector<10x32xf32>
    %11 = vector.broadcast %3 : vector<1x32xf32> to vector<10x32xf32>
    %12 = arith.addf %10, %11 : vector<10x32xf32>
    %cst_7 = arith.constant 0.000000e+00 : f32
    %13 = vector.broadcast %cst_7 : f32 to vector<10x32xf32>
    %14 = arith.maximumf %12, %13 : vector<10x32xf32>
    %c0_8 = arith.constant 0 : index
    %c0_9 = arith.constant 0 : index
    %15 = vector.load %arg4[%c0_8, %c0_9] : memref<96x32xf32, #tpu.memory_space<vmem>>, vector<96x32xf32>
    %c0_10 = arith.constant 0 : index
    %c0_11 = arith.constant 0 : index
    %16 = vector.load %arg5[%c0_10, %c0_11] : memref<1x32xf32, #tpu.memory_space<vmem>>, vector<1x32xf32>
    %cst_12 = arith.constant 0.000000e+00 : f32
    %17 = vector.broadcast %cst_12 : f32 to vector<4x32xf32>
    %18 = tpu.concatenate %17, %14, %17 in 0 : vector<4x32xf32>, vector<10x32xf32>, vector<4x32xf32> -> vector<18x32xf32>
    %19 = vector.extract_strided_slice %18 {offsets = [0, 0], sizes = [14, 32], strides = [1, 1]} : vector<18x32xf32> to vector<14x32xf32>
    %20 = vector.extract_strided_slice %18 {offsets = [2, 0], sizes = [14, 32], strides = [1, 1]} : vector<18x32xf32> to vector<14x32xf32>
    %21 = vector.extract_strided_slice %18 {offsets = [4, 0], sizes = [14, 32], strides = [1, 1]} : vector<18x32xf32> to vector<14x32xf32>
    %22 = tpu.concatenate %19, %20, %21 in 1 : vector<14x32xf32>, vector<14x32xf32>, vector<14x32xf32> -> vector<14x96xf32>
    %cst_13 = arith.constant dense<0.000000e+00> : vector<14x32xf32>
    %23 = tpu.matmul %22, %15, %cst_13 {dimension_numbers = #tpu.dot_dimension_numbers<[1], [0], [0], [1], [0, 0, 1, 1], [], []>} : vector<14x96xf32>, vector<96x32xf32>, vector<14x32xf32> -> vector<14x32xf32>
    %24 = vector.broadcast %16 : vector<1x32xf32> to vector<14x32xf32>
    %25 = arith.addf %23, %24 : vector<14x32xf32>
    %cst_14 = arith.constant 0.000000e+00 : f32
    %26 = vector.broadcast %cst_14 : f32 to vector<14x32xf32>
    %27 = arith.maximumf %25, %26 : vector<14x32xf32>
    %cst_15 = arith.constant dense<0.000000e+00> : vector<32xf32>
    %28 = vector.multi_reduction <add>, %27, %cst_15 [0] : vector<14x32xf32> to vector<32xf32>
    %29 = vector.shape_cast %28 : vector<32xf32> to vector<1x32xf32>
    %cst_16 = arith.constant 1.400000e+01 : f32
    %30 = vector.broadcast %cst_16 : f32 to vector<1x32xf32>
    %31 = arith.divf %29, %30 : vector<1x32xf32>
    %c0_17 = arith.constant 0 : index
    %c0_18 = arith.constant 0 : index
    %32 = vector.load %arg6[%c0_17, %c0_18] : memref<32x1xf32, #tpu.memory_space<vmem>>, vector<32x1xf32>
    %cst_19 = arith.constant dense<0.000000e+00> : vector<1x1xf32>
    %33 = tpu.matmul %31, %32, %cst_19 {dimension_numbers = #tpu.dot_dimension_numbers<[1], [0], [0], [1], [0, 0, 1, 1], [], []>} : vector<1x32xf32>, vector<32x1xf32>, vector<1x1xf32> -> vector<1x1xf32>
    %c0_20 = arith.constant 0 : index
    %c0_21 = arith.constant 0 : index
    %34 = vector.load %arg7[%c0_20, %c0_21] : memref<1x1xf32, #tpu.memory_space<vmem>>, vector<1x1xf32>
    %35 = arith.addf %33, %34 : vector<1x1xf32>
    %36 = arith.negf %35 : vector<1x1xf32>
    %37 = math.exp %36 : vector<1x1xf32>
    %cst_22 = arith.constant 1.000000e+00 : f32
    %38 = vector.broadcast %cst_22 : f32 to vector<1x1xf32>
    %39 = arith.addf %38, %37 : vector<1x1xf32>
    %40 = arith.divf %38, %39 : vector<1x1xf32>
    %cst_23 = arith.constant 0.000000e+00 : f32
    %41 = vector.broadcast %cst_23 : f32 to vector<1x127xf32>
    %42 = tpu.concatenate %40, %41 in 1 : vector<1x1xf32>, vector<1x127xf32> -> vector<1x128xf32>
    %c0_24 = arith.constant 0 : index
    %c0_25 = arith.constant 0 : index
    %c0_26 = arith.constant 0 : index
    %43 = vector.load %arg8[%c0_24, %c0_25, %c0_26] : memref<1x1x128xf32, #tpu.memory_space<vmem>>, vector<1x1x128xf32>
    %44 = vector.shape_cast %43 : vector<1x1x128xf32> to vector<1x128xf32>
    %45 = vector.shape_cast %42 : vector<1x128xf32> to vector<1x1x128xf32>
    tpu.vector_store %arg8[%c0_24, %c0_25, %c0_26], %45 {strides = array<i32>} : memref<1x1x128xf32, #tpu.memory_space<vmem>>, vector<1x1x128xf32>,
    return
  }
  func.func @transform_0(%arg0: i32) -> (i32, i32, i32) {
    %c0_i32 = arith.constant 0 : i32
    %c0_i32_0 = arith.constant 0 : i32
    %c0_i32_1 = arith.constant 0 : i32
    return %arg0, %c0_i32, %c0_i32_0 : i32, i32, i32
  }
  func.func @transform_1(%arg0: i32) -> (i32, i32) {
    %c0_i32 = arith.constant 0 : i32
    %c0_i32_0 = arith.constant 0 : i32
    %c0_i32_1 = arith.constant 0 : i32
    return %c0_i32, %c0_i32_0 : i32, i32
  }
  func.func @transform_2(%arg0: i32) -> (i32, i32) {
    %c0_i32 = arith.constant 0 : i32
    %c0_i32_0 = arith.constant 0 : i32
    %c0_i32_1 = arith.constant 0 : i32
    return %c0_i32, %c0_i32_0 : i32, i32
  }
  func.func @transform_3(%arg0: i32) -> (i32, i32) {
    %c0_i32 = arith.constant 0 : i32
    %c0_i32_0 = arith.constant 0 : i32
    %c0_i32_1 = arith.constant 0 : i32
    return %c0_i32, %c0_i32_0 : i32, i32
  }
  func.func @transform_4(%arg0: i32) -> (i32, i32) {
    %c0_i32 = arith.constant 0 : i32
    %c0_i32_0 = arith.constant 0 : i32
    %c0_i32_1 = arith.constant 0 : i32
    return %c0_i32, %c0_i32_0 : i32, i32
  }
  func.func @transform_5(%arg0: i32) -> (i32, i32) {
    %c0_i32 = arith.constant 0 : i32
    %c0_i32_0 = arith.constant 0 : i32
    %c0_i32_1 = arith.constant 0 : i32
    return %c0_i32, %c0_i32_0 : i32, i32
  }
  func.func @transform_6(%arg0: i32) -> (i32, i32) {
    %c0_i32 = arith.constant 0 : i32
    %c0_i32_0 = arith.constant 0 : i32
    %c0_i32_1 = arith.constant 0 : i32
    return %c0_i32, %c0_i32_0 : i32, i32
  }
  func.func @transform_7(%arg0: i32) -> (i32, i32, i32) {
    %c0_i32 = arith.constant 0 : i32
    %c0_i32_0 = arith.constant 0 : i32
    %c0_i32_1 = arith.constant 0 : i32
    return %arg0, %c0_i32, %c0_i32_0 : i32, i32, i32
  }
}

</mosaic_0001>

<bundles_post_ra>
// kernel: tpu_custom_call.1
= control target key start
LH: loop header
LB: loop body
LE: loop exit
PB: predicated region body
PF: predicated region fallthrough
CT: control target
= control target key end

     0   :  { %s937_s0 = inlined_call_operand.vmem [shape: f32[2,8,16], index: 0, kind: input, shape index: {}]   ;;  %s938_s1 = inlined_call_operand.vmem [shape: f32[48,32], index: 1, kind: input, shape index: {}]   ;;  %s939_s2 = inlined_call_operand.vmem [shape: f32[1,32], index: 2, kind: input, shape index: {}]   ;;  %s940_s3 = inlined_call_operand.vmem [shape: f32[96,32], index: 3, kind: input, shape index: {}]   ;;  %s941_s4 = inlined_call_operand.vmem [shape: f32[1,32], index: 4, kind: input, shape index: {}]   ;;  %s942_s5 = inlined_call_operand.vmem [shape: f32[32,1], index: 5, kind: input, shape index: {}]   ;;  %s943_s6 = inlined_call_operand.<no memory space> [shape: f32[1,1], index: 6, kind: input, shape index: {}]   ;;  %s944_s7 = inlined_call_operand.hbm [shape: f32[2,1,128], index: 7, kind: output, shape index: {}]  }
   0x1   :  { %v12_v0 = vstv %s943_s6 }
   0x2   :  { %13 = vst [vmem:[#allocation2] sm:$0x1] %v12_v0 }
   0x3   :  { %14 = vsyncpa [#allocation4], 0 }
   0x4   :  { %16 = vsyncpa [#allocation4 + $0x1], 0  ;;  %s763_s26 = smov 0   ;;  %s765_s27 = smov 0  }
   0x5   :  { %s767_s28 = smov 0   ;;  %s769_s29 = smov 0  }
   0x6 LB: > { %s784_s6 = sadd.s32 4294967295, %s713_s29   ;;  %s574_s30 = sadd.s32 4294967294, %s713_s29   ;;  %s713_s29 = sphi %s769_s29, %s950_s29   ;;  %s709_s28 = sphi %s767_s28, %s949_s28   ;;  %s705_s27 = sphi %s765_s27, %s948_s27   ;;  %s701_s26 = sphi %s763_s26, %s947_s26  }
   0x7   : > { %s788_s8 = sadd.s32 1, %s713_s29   ;;  %s181_s9 = sadd.s32 1, %s709_s28 }
   0x8   : > { %s178_s10 = ssub.s32 %s713_s29, %s788_s8  ;;  %p191_p0 = scmp.ne.s32.totalorder %s709_s28, %s705_s27 }
   0x9   : > { %p179_p1 = scmp.eq.s32.totalorder %s178_s10, 0  ;;  %p192_p2 = scmp.eq.s32.totalorder %s784_s6, 1 }
   0xa   : > { %p197_p3 = scmp.ne.s32.totalorder %s705_s27, %s701_s26  ;;  %p198_p4 = scmp.eq.s32.totalorder %s574_s30, 1 }
   0xb   : > { %s799_s11 = scalar_select %p179_p1, %s709_s28, %s181_s9  }
   0xc   : > { %p801_p5 = por %p192_p2, %p191_p0  ;;  %p805_p6 = por %p198_p4, %p197_p3 }
   0xd   : > { %p577_p7 = scmp.ge.s32.totalorder %s713_s29, 1  ;;  %p241_p8 = scmp.lt.s32.totalorder %s713_s29, 3 }
   0xf   : > { %p242_p9 = pnand %p577_p7, %p241_p8 }
  0x10   : > { %p271_p10 = scmp.lt.s32.totalorder (!%p242_p9), %s784_s6, 1  ;;  %s715_s21 = smov (!%p242_p9), 16  }
  0x11   : > { %245 = sbr.rel (%p242_p9) target bundleno = 732 (0x2dc), region = 48  ;;  %s716_s22 = smov (!%p242_p9), 32  }
  0x12   : > { %s269_s9 = sand.u32 (!%p242_p9), 1, %s705_s27   ;;  %s515_s14 = scalar_lea.hbm (!%p242_p9), %s944_s7, %s784_s6 }
  0x13   : > { %s270_s15 = scalar_lea.vmem (!%p242_p9), [#allocation3], %s269_s9  ;;  %s671_s23 = scalar_lea.hbm (!%p242_p9), %s944_s7, 2 }
  0x16   : > { %v281_v1 = vld [vmem:[%s938_s1 + $0x28] sm:$0xff]  ;;  %s272_s16 = scalar_select %p271_p10, %s784_s6, 1  ;;  %vm286_vm0 = vcmask 1041408   ;;  %vm291_vm1 = vcmask 1046528   ;;  %vm301_vm2 = vcmask 1045504   ;;  %v280_v12 = vld [vmem:[%s938_s1 + $0x20] sm:$0xff] }
  0x17   : > { %337 = vmatpush.msra.mxu0 %v281_v1  ;;  %v279_v13 = vld [vmem:[%s938_s1 + $0x18] sm:$0xff]  ;;  %v278_v14 = vld [vmem:[%s938_s1 + $0x10] sm:$0xff]  ;;  %v277_v15 = vld [vmem:[%s938_s1 + $0x8] sm:$0xff]  ;;  %vm311_vm3 = vcmask 130048   ;;  %vm314_vm4 = vcmask 261120   ;;  %vm320_vm5 = vcmask 392192  }
  0x18   : > { %s578_s17 = sshll.u32 %s272_s16, 3  ;;  %v276_v16 = vld [vmem:[%s938_s1] sm:$0xff]  ;;  %v363_v25 = vld [vmem:[%s940_s3 + $0x58] sm:$0xff]  ;;  %v362_v26 = vld [vmem:[%s940_s3 + $0x50] sm:$0xff]  ;;  %vm367_vm6 = vcmask 1043456   ;;  %v718_v50 = vmov 0.0  }
  0x19   : > { %s274_s20 = scalar_lea.vmem %s937_s0, %s578_s17  ;;  %338 = vmatpush.msra.mxu0 %v280_v12  ;;  %587 = vmatpush.msra.mxu3 %v363_v25  ;;  %v361_v27 = vld [vmem:[%s940_s3 + $0x48] sm:$0xff]  ;;  %v643_v28 = vld [vmem:[%s939_s2] ss:$0 sm:$0xff]  ;;  %v359_v31 = vld [vmem:[%s940_s3 + $0x38] sm:$0xff]  ;;  %v390_v51 = vrot.slane %v718_v50, 4  ;;  %vm400_vm7 = vcmask 523264  }
  0x1a   : > { %v275_v2 = vld [vmem:[%s274_s20] sm:$0xff]  ;;  %417 = vmatpush.msra.mxu1 %v363_v25  ;;  %v358_v33 = vld [vmem:[%s940_s3 + $0x30] sm:$0xff]  ;;  %v357_v34 = vld [vmem:[%s940_s3 + $0x28] sm:$0xff]  ;;  %s717_s20 = smov 64   ;;  %vm406_vm8 = vcmask 785408   ;;  %vm439_vm9 = vcmask 259072  }
  0x1b   : > { %v284_v3 = vrot.slane %v275_v2, 6  ;;  %339 = vmatpush.msra.mxu0 %v279_v13  ;;  %588 = vmatpush.msra.mxu3 %v362_v26  ;;  %v360_v29 = vld [vmem:[%s940_s3 + $0x40] sm:$0xff]  ;;  %v355_v54 = vld [vmem:[%s940_s3 + $0x18] sm:$0xff]  ;;  %v354_v55 = vld [vmem:[%s940_s3 + $0x10] sm:$0xff]  ;;  %s517_s16 = sshll.u32 %s270_s15, 4  ;;  %s519_s17 = sshll.u32 %s515_s14, 4  ;;  %s518_s16 = int_to_ptr.vmem [resolvable:$true] %s517_s16  ;;  %s520_s17 = int_to_ptr.hbm [resolvable:$true] %s519_s17 }
  0x1c   : > { %418 = vmatpush.msra.mxu1 %v362_v26  ;;  %v356_v53 = vld [vmem:[%s940_s3 + $0x20] sm:$0xff]  ;;  %v353_v56 = vld [vmem:[%s940_s3 + $0x8] sm:$0xff]  ;;  %v459_v2 = vld [vmem:[%s942_s5 + $0x18] sm:$0xff]  ;;  %vm503_vm14 = vcmask 7168   ;;  %s507_s6 = scalar_lea.sflag [#allocation4], %s269_s9  ;;  %s665_s18 = sshra.s32 %s520_s17, 4  ;;  %s666_s18 = int_to_ptr.hbm [resolvable:$true] %s665_s18 }
  0x1d   : > { %v287_v4 = vsel %vm286_vm0, 0.0, %v284_v3  ;;  %v288_v5 = vsel %vm286_vm0, %v284_v3, 0.0  ;;  %340 = vmatpush.msra.mxu0 %v278_v14  ;;  %589 = vmatpush.msra.mxu3 %v361_v27  ;;  %v352_v57 = vld [vmem:[%s940_s3] sm:$0xff]  ;;  %v458_v3 = vld [vmem:[%s942_s5 + $0x10] sm:$0xff]  ;;  %s667_s19 = scalar_lea.hbm %s666_s18, 1  ;;  %p672_p0 = scmp.lt.s32.totalorder %s666_s18, %s944_s7 }
  0x1e   : > { %v292_v6 = vrot.slane %v287_v4, 1  ;;  %v293_v7 = vrot.slane %v288_v5, 1  ;;  %v302_v9 = vrot.slane %v287_v4, 2  ;;  %v303_v10 = vrot.slane %v288_v5, 2  ;;  %419 = vmatpush.msra.mxu1 %v361_v27  ;;  %476 = vmatpush.msra.mxu2 %v459_v2  ;;  %p668_p11 = scmp.ne.s32.totalorder %s666_s18, %s667_s19  ;;  %p673_p1 = scmp.lt.s32.totalorder %s671_s23, %s667_s19 }
  0x1f   : > { %341 = vmatpush.msra.mxu0 %v277_v15  ;;  %590 = vmatpush.msra.mxu3 %v360_v29 }
  0x20   : > { %v294_v8 = vsel %vm291_vm1, %v292_v6, %v293_v7  ;;  %297 = vrot.lane.b32.xlu1 %v293_v7, %s715_s21  ;;  %v304_v11 = vsel %vm301_vm2, %v302_v9, %v303_v10  ;;  %420 = vmatpush.msra.mxu1 %v360_v29  ;;  %v719_v6 = vmov 14.0   ;;  %v644_v7 = vld [vmem:[%s941_s4] ss:$0 sm:$0xff]  ;;  %p669_p12 = pnand %p668_p11, %p801_p5  ;;  %p674_p2 = por %p673_p1, %p672_p0 }
  0x21   : > { %295 = vrot.lane.b32.xlu0 %v294_v8, %s715_s21  ;;  %342 = vmatpush.msra.mxu0 %v276_v16  ;;  %645 = vrcp.f32 %v719_v6 }
  0x22   : > { %591 = vmatpush.msra.mxu3 %v359_v31  ;;  %421 = vmatpush.msra.mxu1 %v359_v31  ;;  %p670_p13 = pneg %p669_p12 }
  0x23   : > { %477 = vmatpush.msra.mxu2 %v458_v3 }
  0x24   : > { %592 = vmatpush.msra.mxu3 %v358_v33  ;;  %422 = vmatpush.msra.mxu1 %v358_v33  ;;  %p675_p3 = pnand %p674_p2, %p670_p13 }
  0x26   : > { %593 = vmatpush.msra.mxu3 %v357_v34  ;;  %423 = vmatpush.msra.mxu1 %v357_v34 }
  0x28   : > { %307 = vrot.lane.b32.xlu1 %v303_v10, %s716_s22  ;;  %594 = vmatpush.msra.mxu3 %v356_v53  ;;  %v646_v10 = vpop.eup %645 }
  0x29   : > { %305 = vrot.lane.b32.xlu0 %v304_v11, %s716_s22  ;;  %424 = vmatpush.msra.mxu1 %v356_v53  ;;  %v449_v14 = vmul.f32 14.0, %v646_v10  ;;  %vm453_vm10 = vweird.f32 %v646_v10 }
  0x2a   : > { %595 = vmatpush.msra.mxu3 %v355_v54 }
  0x2b   : > { %425 = vmatpush.msra.mxu1 %v355_v54 }
  0x2c   : > { %596 = vmatpush.msra.mxu3 %v354_v55 }
  0x2d   : > { %426 = vmatpush.msra.mxu1 %v354_v55 }
  0x2e   : > { %597 = vmatpush.msra.mxu3 %v353_v56 }
  0x2f   : > { %427 = vmatpush.msra.mxu1 %v353_v56 }
  0x30   : > { %598 = vmatpush.msra.mxu3 %v352_v57 }
  0x31   : > { %428 = vmatpush.msra.mxu1 %v352_v57 }
  0x92   : > { %v298_v18 = vpop.permute.xlu1 %297 }
  0x93   : > { %v296_v17 = vpop.permute.xlu0 %295  ;;  %v313_v22 = vsel %vm311_vm3, %v288_v5, %v298_v18  ;;  %v456_v5 = vld [vmem:[%s942_s5] sm:$0xff]  ;;  %v450_v18 = vsub.f32 1.0, %v449_v14 }
  0x94   : > { %v312_v19 = vsel %vm311_vm3, %v287_v4, %v296_v17  ;;  %v457_v4 = vld [vmem:[%s942_s5 + $0x8] sm:$0xff] }
  0x95   : > { %478 = vmatpush.msra.mxu2 %v457_v4 }
  0x97   : > { %479 = vmatpush.msra.mxu2 %v456_v5 }
  0x9a   : > { %v308_v23 = vpop.permute.xlu1 %307 }
  0x9b   : > { %v306_v20 = vpop.permute.xlu0 %305  ;;  %v316_v24 = vsel %vm314_vm4, %v313_v22, %v308_v23 }
  0x9c   : > { %v315_v21 = vsel %vm314_vm4, %v312_v19, %v306_v20 }
  0x9d   : > { %579 = vmatmul.msk.f32.vlgmr.msra.gmra.mxu0 %vm320_vm5, %v315_v21  ;;  %v451_v21 = vmul.f32 %v646_v10, %v450_v18 }
  0xa5   : > { %580 = vmatmul.msk.f32.gmra.mxu0 %vm320_vm5, %v316_v24  ;;  %v452_v24 = vadd.f32 %v646_v10, %v451_v21 }
  0xa7   : > { %v454_v27 = vsel %vm453_vm10, %v646_v10, %v452_v24 }
 0x11a   : > { %v344_v30 = vpop.f32.mrf.mxu0 }
 0x11b   : > { %v345_v32 = vadd.f32 %v643_v28, %v344_v30  ;;  %v460_v30 = vld [vmem:[#allocation2] sm:$0x1] }
 0x11d   : > { %v350_v35 = vmax.f32 %v345_v32, 0.0 }
 0x11f   : > { %v368_v38 = vrot.slane %v350_v35, 4 }
 0x121   : > { %v373_v41 = vsel %vm367_vm6, 0.0, %v368_v38 }
 0x122   : > { %v347_v36 = vpop.f32.mrf.mxu0  ;;  %v377_v44 = vrot.slane %v373_v41, 2  ;;  %v387_v45 = vrot.slane %v373_v41, 4 }
 0x123   : > { %v348_v37 = vadd.f32 %v643_v28, %v347_v36 }
 0x125   : > { %v351_v39 = vmax.f32 %v348_v37, 0.0 }
 0x127   : > { %v369_v40 = vrot.slane %v351_v39, 4 }
 0x129   : > { %v370_v42 = vsel %vm367_vm6, %v368_v38, %v369_v40 }
 0x12a   : > { %v374_v43 = vsel %vm301_vm2, %v370_v42, 0.0 }
 0x12b   : > { %v378_v46 = vrot.slane %v374_v43, 2  ;;  %v388_v47 = vrot.slane %v374_v43, 4 }
 0x12d   : > { %382 = vrot.lane.b32.xlu2 %v378_v46, %s716_s22  ;;  %v389_v48 = vsel %vm367_vm6, %v387_v45, %v388_v47  ;;  %v379_v49 = vsel %vm301_vm2, %v377_v44, %v378_v46  ;;  %v391_v52 = vsel %vm367_vm6, %v388_v47, %v390_v51 }
 0x12e   : > { %392 = vrot.lane.b32.xlu1 %v389_v48, %s717_s20  ;;  %380 = vrot.lane.b32.xlu0 %v379_v49, %s716_s22 }
 0x135   : > { %394 = vrot.lane.b32.xlu2 %v391_v52, %s717_s20 }
 0x187   : > { %v383_v58 = vpop.permute.xlu2 %382 }
 0x188   : > { %v399_v59 = vsel %vm314_vm4, %v374_v43, %v383_v58 }
 0x18f   : > { %v395_v60 = vpop.permute.xlu2 %394 }
 0x190   : > { %v402_v61 = vsel %vm400_vm7, %v399_v59, %v395_v60 }
 0x191   : > { %582 = vmatmul.msk.f32.vlgmr.msra.gmra.mxu3 %vm406_vm8, %v402_v61 }
 0x1a0   : > { %v393_v62 = vpop.permute.xlu1 %392  ;;  %v381_v63 = vpop.permute.xlu0 %380 }
 0x1a1   : > { %v398_v0 = vsel %vm314_vm4, %v373_v41, %v381_v63 }
 0x1a2   : > { %v401_v1 = vsel %vm400_vm7, %v398_v0, %v393_v62 }
 0x1a3   : > { %581 = vmatmul.msk.f32.vlgmr.msra.gmra.mxu1 %vm406_vm8, %v401_v1 }
 0x214   : > { %v433_v8 = vpop.f32.mrf.mxu3 }
 0x215   : > { %v434_v9 = vadd.f32 %v644_v7, %v433_v8 }
 0x217   : > { %v437_v12 = vmax.f32 %v434_v9, 0.0 }
 0x219   : > { %v440_v16 = vsel %vm439_vm9, %v437_v12, 0.0 }
 0x220   : > { %v430_v11 = vpop.f32.mrf.mxu1 }
 0x221   : > { %v431_v13 = vadd.f32 %v644_v7, %v430_v11 }
 0x223   : > { %v436_v15 = vmax.f32 %v431_v13, 0.0 }
 0x225   : > { %v438_v17 = vsel %vm314_vm4, %v436_v15, 0.0 }
 0x226   : > { %v441_v19 = vadd.f32 %v440_v16, %v438_v17 }
 0x228   : > { %v442_v20 = vrot.slane %v441_v19, 4 }
 0x22a   : > { %v443_v22 = vadd.f32 %v442_v20, %v441_v19 }
 0x22c   : > { %v444_v23 = vrot.slane %v443_v22, 2 }
 0x22e   : > { %v445_v25 = vadd.f32 %v444_v23, %v443_v22 }
 0x230   : > { %v446_v26 = vrot.slane %v445_v25, 1 }
 0x232   : > { %v447_v28 = vadd.f32 %v446_v26, %v445_v25 }
 0x234   : > { %v455_v29 = vmul.f32 %v454_v27, %v447_v28 }
 0x236   : > { %583 = vmatmul.msk.f32.vlgmr.msra.gmra.mxu2 %vm314_vm4, %v455_v29 }
 0x2b9   : > { %v481_v31 = vpop.f32.mrf.mxu2 }
 0x2ba   : > { %v482_v32 = vadd.f32 %v481_v31, %v460_v30 }
 0x2bc   : > { %v584_v33 = vmul.f32 -1.442695, %v482_v32 }
 0x2be   : > { %647 = vpow2.f32 %v584_v33 }
 0x2c4   : > { %v648_v34 = vpop.eup %647 }
 0x2c5   : > { %v487_v35 = vadd.f32 1.0, %v648_v34 }
 0x2c7   : > { %649 = vrcp.f32 %v487_v35  ;;  %v499_v39 = vand.u32 2147483648, %v487_v35  ;;  %v497_v41 = vand.u32 2147483647, %v487_v35  ;;  %vm493_vm12 = vweird.f32 %v487_v35 }
 0x2c9   : > { %v500_v43 = vor.u32 1.1754944e-38, %v499_v39  ;;  %vm498_vm15 = vcmp.eq.f32.partialorder %v497_v41, 8.507059e+37 }
 0x2cd   : > { %v650_v36 = vpop.eup %649 }
 0x2ce   : > { %v489_v37 = vmul.f32 %v650_v36, %v487_v35  ;;  %vm494_vm11 = vweird.f32 %v650_v36 }
 0x2cf   : > { %vm495_vm13 = vmor %vm493_vm12, %vm494_vm11 }
 0x2d0   : > { %v490_v38 = vsub.f32 1.0, %v489_v37 }
 0x2d2   : > { %v491_v40 = vmul.f32 %v650_v36, %v490_v38 }
 0x2d4   : > { %v492_v42 = vadd.f32 %v650_v36, %v491_v40 }
 0x2d6   : > { %v496_v44 = vsel %vm495_vm13, %v650_v36, %v492_v42 }
 0x2d7   : > { %v501_v45 = vsel %vm498_vm15, %v500_v43, %v496_v44 }
 0x2d8   : > { %v504_v46 = vsel %vm503_vm14, %v501_v45, 0.0 }
 0x2d9   : > { %505 = vst [vmem:[%s270_s15] sm:$0x1] %v504_v46 }
 0x2da   : > { %678 = shalt.err (!%p675_p3)
}
 0x2db   : > { %599 = dma.vmem_to_hbm [thread:$0]  (%p801_p5), %s518_s16, 16, %s520_s17, %s507_s6  }
 0x2dc PF: > { %p605_p4 = scmp.ge.s32.totalorder %s713_s29, 2  ;;  %s531_s30 = sand.u32 1, %s701_s26  }
 0x2dd   : > { %s532_s9 = scalar_lea.sflag [#allocation4], %s531_s30 }
 0x2de   : > { %p602_p7 = pnand %p605_p4, %p805_p6 }
 0x2e0   : > { %p603_p8 = pneg %p602_p7 }
 0x2e2   : > { %696 = dma.done.wait (%p603_p8), %s532_s9, 16  }
 0x2e3   : > { %698 = vsyncadd (%p603_p8), %s532_s9, 4294967280  ;;  %p19_p9 = scmp.ge.s32.totalorder %s788_s8, 4   ;;  %s947_s26 = smov %s705_s27 }
 0x2e4   : > { %s948_s27 = smov %s709_s28  ;;  %s949_s28 = smov %s799_s11 }
 0x2e5   : > { %s950_s29 = smov %s788_s8  ;;  %21 = sbr.rel (!%p19_p9) target bundleno = 6 (0x6), region = 83 }
 0x2ea   :  { %537 = vsyncpa [#allocation4], 1 }
 0x2eb   :  { %539 = vsyncpa [#allocation4 + $0x1], 1 }

</bundles_post_ra>
